<compile_context>
chip_gen: v7x
topology: tpu7x:2x2x1
jax: 0.10.0
libtpu: 0.0.40
codegen_flags: <defaults>
</compile_context>

<pallas_src>
import jax
import jax.numpy as jnp
from jax.experimental import pallas as pl
from jax.experimental.pallas import tpu as pltpu


def _cdiv(a, b):
    return -(-a // b)


def _round_up(v, m):
    return ((v + m - 1) // m) * m


def _vmem_capacity_bytes():
    try:
        return int(pltpu.get_tpu_info().vmem_capacity_bytes)
    except Exception:
        return 64 << 20          # conservative fallback (v7x-sized), safe on all gens


# --------------------------------------------------------------------------- #
# Kernel
# --------------------------------------------------------------------------- #
def residual_kernel(x_ref, w_ref, b_ref, o_ref):
    # x_ref: (bm, H)   w_ref: (H, tn)   b_ref: (1, tn) f32   o_ref: (bm, tn)
    H = x_ref.shape[-1]
    tn = o_ref.shape[-1]

    x = x_ref[...]
    # MXU operands in the weight dtype (bf16 fast path), f32 accumulation.
    h = jnp.dot(x.astype(w_ref.dtype), w_ref[...],
                preferred_element_type=jnp.float32)
    # Epilogue entirely in f32 (v5e has no bf16 VPU path): bias, ReLU, residual.
    h = jnp.maximum(h + b_ref[...], 0.0)

    if tn == H:                       # static: weight fully resident along N
        x_res = x
    else:                             # N-tiled weight: residual uses its slice of x
        j = pl.program_id(0)
        start = pl.multiple_of(j * tn, 128)
        x_res = x_ref[:, pl.ds(start, tn)]

    o_ref[...] = (x_res.astype(jnp.float32) + h).astype(o_ref.dtype)


# --------------------------------------------------------------------------- #
# Wrapper
# --------------------------------------------------------------------------- #
def prepare_residual_params(w, b, *, mxu_dtype=jnp.bfloat16):
    """Hoist the per-call weight/bias casts: do them once, reuse across calls."""
    H = w.shape[0]
    w_prep = w if w.dtype == mxu_dtype else w.astype(mxu_dtype)
    b_prep = b.reshape(1, H)
    if b_prep.dtype != jnp.float32:
        b_prep = b_prep.astype(jnp.float32)
    return w_prep, b_prep


def _plan_tiles(B, H, x_dtype, out_dtype, w_dtype, *, bm=None, tn=None):
    xb = jnp.dtype(x_dtype).itemsize
    ob = jnp.dtype(out_dtype).itemsize
    wb = jnp.dtype(w_dtype).itemsize

    vmem_cap = _vmem_capacity_bytes()
    budget = vmem_cap - (8 << 20)          # headroom for Mosaic internal scratch

    # ---- weight (N) tiling -------------------------------------------------
    if tn is not None:
        assert H % tn == 0 and (tn == H or tn % 128 == 0), "tn must tile H"
    elif H * H * wb <= budget // 2:
        tn = H                              # fully resident, single-buffered
    else:
        # double-buffered (H, tn) weight tiles within half the budget
        tn = (budget // 2) // (2 * H * wb)
        tn = max(128, (tn // 128) * 128)
        tn = min(tn, H)
        while tn > 128 and H % tn != 0:     # keep residual slice aligned
            tn -= 128
        if H % 128 != 0 or H % tn != 0:
            tn = H                          # TODO(synk): ragged N tiles for odd H
    n_j = _cdiv(H, tn)
    w_bufs = 1 if n_j == 1 else 2           # Buffered(1) when grid-invariant
    w_vmem = w_bufs * H * tn * wb

    # ---- batch tiling --------------------------------------------------------
    if bm is not None:
        bm = max(8, _round_up(int(bm), 8))
    else:
        target = 4 << 20                    # ~4 MiB x tile (HBM-bound regime)
        bm = max(128, ((target // max(1, H * xb)) // 128) * 128)
    per_row = 2 * H * xb + 2 * tn * ob      # double-buffered x + out tiles
    avail = max(per_row * 8, budget - w_vmem - (2 << 20))
    bm = min(bm, max(8, (avail // per_row // 8) * 8))
    if B > 16:
        # >= 2 batch grid steps so both v7x TensorCores get work (harmless on
        # single-TC v5e/v6e: one extra ~0.35 us grid step).
        bm = min(bm, _round_up(_cdiv(B, 2), 8))
    bm = min(bm, _round_up(B, 8))
    if bm >= B:
        bm = B                               # full-dim block (no 8-alignment needed)
    n_i = _cdiv(B, bm)

    needed = (w_vmem
              + 2 * bm * H * xb              # double-buffered x tiles
              + 2 * bm * tn * ob             # double-buffered out tiles
              + 2 * tn * 4                   # bias
              + (2 << 20))                   # Mosaic scratch margin
    vmem_limit = int(min(max(needed, 32 << 20), vmem_cap - (4 << 20)))
    return bm, tn, n_i, n_j, vmem_limit


def residual_forward(x, w, b, *, bm=None, tn=None, mxu_dtype=jnp.bfloat16,
                     donate_input=False):
    """out = x + relu(x @ w + b), fused in one Pallas TPU kernel.

    bm:  batch tile override (rows / grid step). Default: auto (~4 MiB x tile,
         >= 2 grid steps for v7x's two TensorCores).
    tn:  weight N-tile override. Default: full H when the weight fits VMEM,
         otherwise an N-tiled weight with a second grid axis.
    mxu_dtype: dtype fed to the MXU (bf16 fast path; jnp.float32 for exact).
         Pass an already-cast weight (prepare_residual_params) to avoid a
         per-call HBM pass for the cast.
    donate_input: alias x's buffer to the output (only applied when safe).
    """
    B, H = x.shape
    out_dtype = x.dtype

    # Cast only if needed; prefer prepare_residual_params() to hoist this.
    w_in = w if w.dtype == mxu_dtype else w.astype(mxu_dtype)
    b2d = b.reshape(1, H)
    if b2d.dtype != jnp.float32:
        b2d = b2d.astype(jnp.float32)

    bm, tn, n_i, n_j, vmem_limit = _plan_tiles(
        B, H, x.dtype, out_dtype, w_in.dtype, bm=bm, tn=tn)

    # Grid: (N-tiles outer, batch tiles inner) -> weight block is held across
    # the whole inner batch loop; x/out stream.  Partial final batch block is
    # masked by Pallas (rows are independent, so stale padding rows are inert).
    grid = (n_j, n_i)
    const_mode = pl.Buffered(1) if n_j == 1 else pl.Buffered(2)

    extra = {}
    # Aliasing is only safe when the weight is not N-tiled: with n_j > 1 the
    # full x row is re-read from HBM at every j step and would have been
    # partially overwritten by earlier output columns.
    if donate_input and n_j == 1 and x.dtype == out_dtype:
        extra["input_output_aliases"] = {0: 0}

    out = pl.pallas_call(
        residual_kernel,
        out_shape=jax.ShapeDtypeStruct((B, H), out_dtype),
        grid_spec=pltpu.PrefetchScalarGridSpec(
            num_scalar_prefetch=0,
            grid=grid,
            in_specs=[
                pl.BlockSpec((bm, H), lambda j, i: (i, 0)),            # x tile
                pl.BlockSpec((H, tn), lambda j, i: (0, j),
                             pipeline_mode=const_mode),                # weight
                pl.BlockSpec((1, tn), lambda j, i: (0, j),
                             pipeline_mode=const_mode),                # bias
            ],
            out_specs=pl.BlockSpec((bm, tn), lambda j, i: (i, j)),
        ),
        compiler_params=pltpu.CompilerParams(
            dimension_semantics=("arbitrary", "parallel"),  # batch axis -> both TCs
            vmem_limit_bytes=vmem_limit,
        ),
        **extra,
    )(x, w_in, b2d)
    return out


# --------------------------------------------------------------------------- #
# Demo / self-test
# --------------------------------------------------------------------------- #
if __name__ == "__main__":
    key = jax.random.PRNGKey(0)
    kx, kw, kb = jax.random.split(key, 3)

    # Small demo shapes. batch deliberately NOT a multiple of the tile to
    # exercise the ragged (masked) final block; hidden = 128 (one lane width).
    batch, hidden = 40, 128
    x = jax.random.normal(kx, (batch, hidden), dtype=jnp.float32)
    w = jax.random.normal(kw, (hidden, hidden), dtype=jnp.float32) * 0.02
    b = jax.random.normal(kb, (hidden,), dtype=jnp.float32) * 0.01

    # Reference in plain JAX (x + fn(x)).
    ref = x + jnp.maximum(x @ w + b, 0.0)

    # 1) Exact f32-MXU path, small forced batch tile -> multi-step grid with a
    #    ragged, masked final block (no wrapper-side padding / slicing).
    out_f32 = jax.block_until_ready(
        residual_forward(x, w, b, bm=16, mxu_dtype=jnp.float32))
    assert out_f32.shape == x.shape
    assert jnp.allclose(out_f32, ref, atol=1e-5, rtol=1e-5)

    # 2) Default fast path: auto batch tile (>= 2 grid steps), bf16 MXU
    #    operands pre-cast once outside the call, f32 accumulation / epilogue.
    w_bf16, b_f32 = prepare_residual_params(w, b)
    out_bf16 = jax.block_until_ready(residual_forward(x, w_bf16, b_f32))
    assert out_bf16.shape == x.shape
    assert jnp.allclose(out_bf16, ref, atol=3e-2, rtol=3e-2)

    # 3) Exercise the N-tiled weight path (tn < H) used for large hidden sizes.
    hidden2 = 256
    kx2, kw2, kb2 = jax.random.split(jax.random.PRNGKey(1), 3)
    x2 = jax.random.normal(kx2, (batch, hidden2), dtype=jnp.float32)
    w2 = jax.random.normal(kw2, (hidden2, hidden2), dtype=jnp.float32) * 0.02
    b2 = jax.random.normal(kb2, (hidden2,), dtype=jnp.float32) * 0.01
    ref2 = x2 + jnp.maximum(x2 @ w2 + b2, 0.0)
    out2 = jax.block_until_ready(
        residual_forward(x2, w2, b2, bm=16, tn=128, mxu_dtype=jnp.float32))
    assert out2.shape == x2.shape
    assert jnp.allclose(out2, ref2, atol=1e-5, rtol=1e-5)

    print("KERNEL_OK")
</pallas_src>

<mosaic_0001>
module attributes {stable_mosaic.version = 11 : i64} {
  func.func @residual_kernel(%arg0: i32, %arg1: i32, %arg2: memref<16x128xf32, #tpu.memory_space<vmem>>, %arg3: memref<128x128xf32, #tpu.memory_space<vmem>>, %arg4: memref<1x128xf32, #tpu.memory_space<vmem>>, %arg5: memref<16x128xf32, #tpu.memory_space<vmem>>) attributes {dimension_semantics = [#tpu.dimension_semantics<arbitrary>, #tpu.dimension_semantics<parallel>], iteration_bounds = array<i64: 1, 3>, scalar_prefetch = 0 : i64, scratch_operands = 0 : i64, tpu.core_type = #tpu.core_type<tc>, window_params = [{transform_indices = @transform_0, window_bounds = array<i64: 16, 128>}, {pipeline_mode = #tpu.pipeline_mode<synchronous>, transform_indices = @transform_1, window_bounds = array<i64: 128, 128>}, {pipeline_mode = #tpu.pipeline_mode<synchronous>, transform_indices = @transform_2, window_bounds = array<i64: 1, 128>}, {transform_indices = @transform_3, window_bounds = array<i64: 16, 128>}]} {
    %c0 = arith.constant 0 : index
    %c0_0 = arith.constant 0 : index
    %0 = vector.load %arg2[%c0, %c0_0] : memref<16x128xf32, #tpu.memory_space<vmem>>, vector<16x128xf32>
    %c0_1 = arith.constant 0 : index
    %c0_2 = arith.constant 0 : index
    %1 = vector.load %arg3[%c0_1, %c0_2] : memref<128x128xf32, #tpu.memory_space<vmem>>, vector<128x128xf32>
    %cst = arith.constant dense<0.000000e+00> : vector<16x128xf32>
    %2 = tpu.matmul %0, %1, %cst {dimension_numbers = #tpu.dot_dimension_numbers<[1], [0], [0], [1], [0, 0, 1, 1], [], []>} : vector<16x128xf32>, vector<128x128xf32>, vector<16x128xf32> -> vector<16x128xf32>
    %c0_3 = arith.constant 0 : index
    %c0_4 = arith.constant 0 : index
    %3 = vector.load %arg4[%c0_3, %c0_4] : memref<1x128xf32, #tpu.memory_space<vmem>>, vector<1x128xf32>
    %4 = vector.broadcast %3 : vector<1x128xf32> to vector<16x128xf32>
    %5 = arith.addf %2, %4 : vector<16x128xf32>
    %cst_5 = arith.constant 0.000000e+00 : f32
    %6 = vector.broadcast %cst_5 : f32 to vector<16x128xf32>
    %7 = arith.maximumf %5, %6 : vector<16x128xf32>
    %8 = arith.addf %0, %7 : vector<16x128xf32>
    %c0_6 = arith.constant 0 : index
    %c0_7 = arith.constant 0 : index
    %9 = vector.load %arg5[%c0_6, %c0_7] : memref<16x128xf32, #tpu.memory_space<vmem>>, vector<16x128xf32>
    tpu.vector_store %arg5[%c0_6, %c0_7], %8 {strides = array<i32>} : memref<16x128xf32, #tpu.memory_space<vmem>>, vector<16x128xf32>,
    return
  }
  func.func @transform_0(%arg0: i32, %arg1: i32) -> (i32, i32) {
    %c0_i32 = arith.constant 0 : i32
    %c0_i32_0 = arith.constant 0 : i32
    return %arg1, %c0_i32 : i32, i32
  }
  func.func @transform_1(%arg0: i32, %arg1: i32) -> (i32, i32) {
    %c0_i32 = arith.constant 0 : i32
    %c0_i32_0 = arith.constant 0 : i32
    return %c0_i32, %arg0 : i32, i32
  }
  func.func @transform_2(%arg0: i32, %arg1: i32) -> (i32, i32) {
    %c0_i32 = arith.constant 0 : i32
    %c0_i32_0 = arith.constant 0 : i32
    return %c0_i32, %arg0 : i32, i32
  }
  func.func @transform_3(%arg0: i32, %arg1: i32) -> (i32, i32) {
    %c0_i32 = arith.constant 0 : i32
    return %arg1, %arg0 : i32, i32
  }
}

</mosaic_0001>

<bundles_post_ra>
// kernel: tpu_custom_call.1
= control target key start
LH: loop header
LB: loop body
LE: loop exit
PB: predicated region body
PF: predicated region fallthrough
CT: control target
= control target key end

     0   :  { %8 = vsyncpa [#allocation3], 0  ;;  %s1083_s0 = inlined_call_operand.hbm [shape: f32[40,128], index: 0, kind: input, shape index: {}]   ;;  %s1084_s1 = inlined_call_operand.hbm [shape: f32[128,128], index: 1, kind: input, shape index: {}]   ;;  %s1085_s2 = inlined_call_operand.vmem [shape: f32[1,128], index: 2, kind: input, shape index: {}]   ;;  %s1086_s3 = inlined_call_operand.hbm [shape: f32[40,128], index: 3, kind: output, shape index: {}]  }
   0x1   :  { %10 = vsyncpa [#allocation3 + $0x1], 0 }
   0x2   :  { %11 = vsyncpa [#allocation6], 0 }
   0x3   :  { %12 = vsyncpa [#allocation4], 0 }
   0x4   :  { %14 = vsyncpa [#allocation4 + $0x1], 0  ;;  %s848_s12 = smov 0   ;;  %s850_s13 = smov 0  }
   0x5   :  { %s852_s14 = smov 0   ;;  %s854_s15 = smov 0  }
   0x6   :  { %s856_s16 = smov 0   ;;  %s858_s17 = smov 0  }
   0x7 LB: > { %s489_s18 = sadd.s32 4294967295, %s817_s17   ;;  %s490_s19 = sadd.s32 4294967294, %s817_s17   ;;  %s817_s17 = sphi %s858_s17, %s20_s17   ;;  %s813_s16 = sphi %s856_s16, %s1108_s16   ;;  %s809_s15 = sphi %s854_s15, %s1107_s15   ;;  %s805_s14 = sphi %s852_s14, %s1106_s14   ;;  %s801_s13 = sphi %s850_s13, %s1105_s13   ;;  %s797_s12 = sphi %s848_s12, %s1104_s12  }
   0x8   : > { %s29_s20 = sadd.s32 1, %s813_s16  ;;  %s39_s21 = sadd.s32 1, %s805_s14 }
   0x9   : > { %p30_p0 = scmp.ge.s32.totalorder %s29_s20, 3  ;;  %p46_p1 = scmp.ne.s32.totalorder %s805_s14, %s801_s13 }
   0xa   : > { %p47_p2 = scmp.eq.s32.totalorder %s817_s17, 0  ;;  %p52_p3 = scmp.ne.s32.totalorder %s801_s13, %s797_s12 }
   0xb   : > { %s1110_s20 = smov (%p30_p0, %s29_s20), 0  ;;  %p893_p5 = scmp.eq.s32.totalorder %s489_s18, 0 }
   0xc   : > { %p889_p4 = por %p47_p2, %p46_p1  ;;  %s36_s24 = ssub.s32 %s813_s16, %s1110_s20 }
   0xd   : > { %s1092_s23 = scalar_select %p893_p5, 1, 0 }
   0xe   : > { %s1091_s22 = scalar_select %p889_p4, 1, 0 }
   0xf   : > { %p130_p6 = scmp.eq.s32.totalorder %s489_s18, 2  ;;  %p37_p7 = scmp.eq.s32.totalorder %s36_s24, 0 }
  0x10   : > { %p901_p8 = por %p893_p5, %p52_p3  ;;  %p136_p10 = scmp.eq.s32.totalorder %s490_s19, 2 }
  0x11   : > { %p905_p9 = por %p130_p6, %p46_p1  ;;  %p491_p12 = scmp.ge.s32.totalorder %s817_s17, 1 }
  0x12   : > { %s1093_s25 = scalar_select %p901_p8, 1, 0 }
  0x13   : > { %s1094_s26 = scalar_select %p905_p9, 1, 0 }
  0x14   : > { %s910_s27 = scalar_select %p37_p7, %s805_s14, %s39_s21  }
  0x15   : > { %p912_p11 = por %p136_p10, %p52_p3  ;;  %p143_p13 = scmp.lt.s32.totalorder %s817_s17, 4 }
  0x16   : > { %s819_s30 = smov [#allocation5]   ;;  %s675_s8 = scalar_lea.hbm %s1084_s1, 2048 }
  0x17   : > { %s1095_s28 = scalar_select %p912_p11, 1, 0 }
  0x18   : > { %p918_p0 = pnand %p491_p12, %p143_p13  ;;  %s157_s4 = sshll.u32 %s819_s30, 4  ;;  %s158_s4 = int_to_ptr.vmem [resolvable:$true] %s157_s4 }
  0x19   : > { %p676_p3 = scmp.ne.s32.totalorder %s1084_s1, %s675_s8  ;;  %p682_p12 = scmp.lt.u32.totalorder %s675_s8, %s1084_s1 }
  0x1a   : > { %s1096_s29 = scalar_select %p918_p0, 1, 0 }
  0x1b   : > { %p609_p1 = pneg %p918_p0 }
  0x1d   : > { %p926_p2 = pnand %p609_p1, %p893_p5 }
  0x1f   : > { %p677_p6 = pneg %p926_p2 }
  0x21   : > { %p678_p7 = pnand %p677_p6, %p676_p3 }
  0x23   : > { %p679_p10 = pneg %p678_p7 }
  0x25   : > { %p684_p13 = pnand %p682_p12, %p679_p10 }
  0x27   : > { %687 = shalt.err (!%p684_p13)
}
  0x28   : > { %s688_s19 = scalar_lea.vmem %s158_s4, 2048  ;;  %p696_p5 = scmp.lt.s32.totalorder %s158_s4, %s158_s4 }
  0x29   : > { %p689_p1 = scmp.ne.s32.totalorder %s158_s4, %s688_s19  ;;  %p697_p8 = scmp.lt.s32.totalorder %s688_s19, %s688_s19 }
  0x2b   : > { %p691_p11 = pnand %p689_p1, %p677_p6  ;;  %p698_p0 = por %p697_p8, %p696_p5 }
  0x2d   : > { %p692_p9 = pneg %p691_p11 }
  0x2f   : > { %p699_p4 = pnand %p698_p0, %p692_p9 }
  0x31   : > { %702 = shalt.err (!%p699_p4)
}
  0x32   : > { %s820_s21 = smov 128   ;;  %s821_s24 = smov 8  }
  0x33   : > { %612 = dma.hbm_to_vmem [thread:$0]  (!%p926_p2), %s1084_s1, 2048, %s158_s4, [#allocation6], %s820_s21, %s820_s21, %s821_s24  }
  0x34   : > { %p494_p3 = scmp.ge.s32.totalorder %s817_s17, 3 }
  0x35   : > { %p1098_p7 = scmp.ne.s32.totalorder (!%p494_p3), %s1091_s22, 0 }
  0x36   : > { %173 = sbr.rel (%p494_p3) target bundleno = 96 (0x60), region = 24 }
  0x3d   : > { %176 = sbr.rel (!%p1098_p7) target bundleno = 96 (0x60), region = 28  ;;  %s177_s7 = sand.u32 (%p1098_p7), 1, %s805_s14  }
  0x3e   : > { %s496_s8 = sshll.u32 (%p1098_p7), %s813_s16, 1  ;;  %s495_s9 = sshll.u32 (%p1098_p7), %s177_s7, 4 }
  0x3f   : > { %s183_s10 = ssub.s32 (%p1098_p7), 5, %s496_s8  ;;  %s954_s18 = scalar_lea.sflag (%p1098_p7), [#allocation3], %s177_s7 }
  0x40   : > { %p184_p4 = scmp.lt.s32.totalorder (%p1098_p7), %s183_s10, 2  ;;  %s181_s4 = scalar_lea.vmem (%p1098_p7), [#allocation2], %s495_s9 }
  0x44   : > { %s1112_s10 = smov (!%p184_p4, %s183_s10), 2 }
  0x45   : > { %s951_s11 = sshll.u32 %s1112_s10, 7 }
  0x46   : > { %s188_s5 = ssub.s32 256, %s951_s11 }
  0x47   : > { %189 = vsyncadd %s954_s18, %s188_s5  ;;  %p498_p5 = scmp.ne.s32.totalorder %s951_s11, 0  ;;  %s516_s22 = sshll.u32 %s813_s16, 8 }
  0x48   : > { %s962_s24 = scalar_lea.hbm %s1083_s0, %s516_s22  ;;  %s194_s30 = sshll.u32 %s181_s4, 4  ;;  %s964_s30 = int_to_ptr.vmem [resolvable:$true] %s194_s30 }
  0x49   : > { %s703_s6 = scalar_lea.hbm %s962_s24, %s951_s11  ;;  %s707_s9 = scalar_lea.hbm %s1083_s0, 640 }
  0x4a   : > { %p704_p8 = scmp.ne.s32.totalorder %s962_s24, %s703_s6  ;;  %p708_p0 = scmp.lt.u32.totalorder %s962_s24, %s1083_s0 }
  0x4b   : > { %p709_p2 = scmp.lt.u32.totalorder %s707_s9, %s703_s6  ;;  %p711_p10 = scmp.lt.u32.totalorder %s703_s6, %s962_s24 }
  0x4c   : > { %p705_p9 = pnand %p704_p8, %p498_p5 }
  0x4d   : > { %p710_p6 = por %p709_p2, %p708_p0 }
  0x4e   : > { %p706_p11 = pneg %p705_p9 }
  0x4f   : > { %p712_p12 = por %p711_p10, %p710_p6 }
  0x51   : > { %p713_p13 = pnand %p712_p12, %p706_p11 }
  0x53   : > { %716 = shalt.err (!%p713_p13)
}
  0x54   : > { %s717_s4 = scalar_lea.vmem %s964_s30, %s951_s11  ;;  %s822_s22 = smov [#allocation2]  }
  0x55   : > { %p718_p1 = scmp.ne.s32.totalorder %s964_s30, %s717_s4  ;;  %s721_s19 = sshll.u32 %s822_s22, 4  ;;  %s722_s19 = int_to_ptr.vmem [resolvable:$false] %s721_s19 }
  0x56   : > { %s723_s21 = scalar_lea.vmem %s722_s19, 512  ;;  %p724_p4 = scmp.lt.s32.totalorder %s964_s30, %s722_s19 }
  0x57   : > { %p719_p3 = pnand %p718_p1, %p498_p5  ;;  %p725_p8 = scmp.lt.s32.totalorder %s723_s21, %s717_s4 }
  0x59   : > { %p720_p7 = pneg %p719_p3  ;;  %p726_p9 = por %p725_p8, %p724_p4 }
  0x5b   : > { %p727_p0 = pnand %p726_p9, %p720_p7 }
  0x5d   : > { %730 = shalt.err (!%p727_p0)
}
  0x5e   : > { %s823_s6 = smov 128   ;;  %s824_s7 = smov 8  }
  0x5f   : > { %200 = dma.hbm_to_vmem [thread:$0]  (%p498_p5), %s962_s24, %s951_s11, %s964_s30, %s954_s18, %s823_s6, %s823_s6, %s824_s7  }
  0x60 PF: > { %p1099_p11 = scmp.ne.s32.totalorder %s1096_s29, 0 }
  0x61   : > { %s994_s8 = sand.u32 (!%p1099_p11), 1, %s801_s13   ;;  %p1100_p2 = scmp.ne.s32.totalorder (!%p1099_p11), %s1093_s25, 0 }
  0x62   : > { %206 = sbr.rel (%p1099_p11) target bundleno = 392 (0x188), region = 32  ;;  %s503_s9 = sshll.u32 (!%p1099_p11), %s994_s8, 4 }
  0x63   : > { %s209_s10 = scalar_lea.sflag (!%p1099_p11), [#allocation3], %s994_s8  ;;  %s1000_s5 = scalar_lea.vmem (!%p1099_p11), [#allocation2], %s503_s9 }
  0x69   : > { %784 = dma.done.wait (%p1100_p2), %s209_s10, 256  }
  0x6a   : > { %786 = vsyncadd (%p1100_p2), %s209_s10, 4294967040  ;;  %p1101_p5 = scmp.ne.s32.totalorder %s1092_s23, 0 }
  0x6c   : > { %788 = dma.done.wait (%p1101_p5), [#allocation6], 2048  }
  0x6d   : > { %790 = vsyncadd (%p1101_p5), [#allocation6], 4294965248  ;;  %v257_v0 = vld [vmem:[#allocation5] sm:$0xff]  ;;  %v258_v1 = vld [vmem:[#allocation5 + $0x8] sm:$0xff]  ;;  %s241_s29 = scalar_lea.vmem [#allocation7], %s503_s9  ;;  %s362_s11 = scalar_lea.sflag [#allocation4], %s994_s8 }
  0x6e   : > { %v259_v2 = vld [vmem:[#allocation5 + $0x10] sm:$0xff]  ;;  %v571_v3 = vpack.c.bf16 %v258_v1, %v257_v0  ;;  %v260_v4 = vld [vmem:[#allocation5 + $0x18] sm:$0xff]  ;;  %v261_v6 = vld [vmem:[#allocation5 + $0x20] sm:$0xff]  ;;  %p1102_p6 = scmp.ne.s32.totalorder %s1094_s26, 0 }
  0x6f   : > { %v575_v5 = vpack.c.bf16 %v260_v4, %v259_v2  ;;  %v262_v7 = vld [vmem:[#allocation5 + $0x28] sm:$0xff]  ;;  %v255_v9 = vld [vmem:[%s1000_s5] sm:$0xff]  ;;  %v264_v11 = vld [vmem:[#allocation5 + $0x38] sm:$0xff]  ;;  %s508_s18 = sshll.u32 (%p1102_p6), %s809_s15, 1 }
  0x70   : > { %572 = vmatprep.subr.bf16.mxu0 %v571_v3  ;;  %v579_v8 = vpack.c.bf16 %v262_v7, %v261_v6  ;;  %v263_v10 = vld [vmem:[#allocation5 + $0x30] sm:$0xff]  ;;  %568 = vmatprep.mubr.f32.mxu0 %v255_v9  ;;  %v265_v13 = vld [vmem:[#allocation5 + $0x40] sm:$0xff]  ;;  %v266_v14 = vld [vmem:[#allocation5 + $0x48] sm:$0xff]  ;;  %s370_s24 = ssub.s32 (%p1102_p6), 5, %s508_s18 }
  0x71   : > { %574 = vmatpush3.bf16.msra.mxu0 %v571_v3  ;;  %v583_v12 = vpack.c.bf16 %v264_v11, %v263_v10  ;;  %v587_v15 = vpack.c.bf16 %v266_v14, %v265_v13  ;;  %v267_v16 = vld [vmem:[#allocation5 + $0x50] sm:$0xff]  ;;  %v268_v17 = vld [vmem:[#allocation5 + $0x58] sm:$0xff]  ;;  %v269_v19 = vld [vmem:[#allocation5 + $0x60] sm:$0xff]  ;;  %p371_p10 = scmp.lt.s32.totalorder (%p1102_p6), %s370_s24, 2 }
  0x72   : > { %576 = vmatprep.subr.bf16.mxu0 %v575_v5  ;;  %v591_v18 = vpack.c.bf16 %v268_v17, %v267_v16  ;;  %v270_v20 = vld [vmem:[#allocation5 + $0x68] sm:$0xff]  ;;  %v271_v22 = vld [vmem:[#allocation5 + $0x70] sm:$0xff]  ;;  %v272_v23 = vld [vmem:[#allocation5 + $0x78] sm:$0xff] }
  0x73   : > { %v595_v21 = vpack.c.bf16 %v270_v20, %v269_v19  ;;  %v599_v24 = vpack.c.bf16 %v272_v23, %v271_v22  ;;  %v256_v25 = vld [vmem:[%s1000_s5 + $0x8] sm:$0xff]  ;;  %v506_v26 = vld [vmem:[%s1085_s2] ss:$0 sm:$0xff] }
  0x75   : > { %578 = vmatpush3.bf16.msra.mxu0 %v575_v5 }
  0x76   : > { %580 = vmatprep.subr.bf16.mxu0 %v579_v8 }
  0x79   : > { %582 = vmatpush3.bf16.msra.mxu0 %v579_v8 }
  0x7a   : > { %584 = vmatprep.subr.bf16.mxu0 %v583_v12 }
  0x7d   : > { %586 = vmatpush3.bf16.msra.mxu0 %v583_v12 }
  0x7e   : > { %588 = vmatprep.subr.bf16.mxu0 %v587_v15 }
  0x81   : > { %590 = vmatpush3.bf16.msra.mxu0 %v587_v15 }
  0x82   : > { %592 = vmatprep.subr.bf16.mxu0 %v591_v18 }
  0x85   : > { %594 = vmatpush3.bf16.msra.mxu0 %v591_v18 }
  0x86   : > { %596 = vmatprep.subr.bf16.mxu0 %v595_v21 }
  0x89   : > { %598 = vmatpush3.bf16.msra.mxu0 %v595_v21 }
  0x8a   : > { %600 = vmatprep.subr.bf16.mxu0 %v599_v24 }
  0x8d   : > { %602 = vmatpush3.bf16.msra.mxu0 %v599_v24 }
  0x90   : > { %569 = vmatmul.mubr.f32.vlgmr.msra.gmra.mrb[0].mxu0 %v256_v25 }
 0x163   : > { %v570_v27 = vpop.f32.mrb[0].mxu0 }
 0x164   : > { %v352_v28 = vadd.f32 %v570_v27, %v506_v26  ;;  %v346_v29 = vpop.f32.mrb[1].mxu0 }
 0x165   : > { %v347_v30 = vadd.f32 %v506_v26, %v346_v29  ;;  %368 = sbr.rel (!%p1102_p6) target bundleno = 392 (0x188), region = 44 }
 0x166   : > { %v356_v31 = vmax.f32 %v352_v28, 0.0 }
 0x167   : > { %v355_v32 = vmax.f32 %v347_v30, 0.0 }
 0x168   : > { %v358_v33 = vadd.f32 %v356_v31, %v256_v25 }
 0x169   : > { %v357_v34 = vadd.f32 %v355_v32, %v255_v9 }
 0x16a   : > { %360 = vst [vmem:[%s241_s29 + $0x8] sm:$0xff] %v358_v33 }
 0x16b   : > { %359 = vst [vmem:[%s241_s29] sm:$0xff] %v357_v34 }
 0x16c   : > { %s1114_s24 = smov (!%p371_p10, %s370_s24), 2 }
 0x16d   : > { %s1021_s30 = sshll.u32 %s1114_s24, 7 }
 0x16e   : > { %s375_s4 = ssub.s32 256, %s1021_s30 }
 0x16f   : > { %376 = vsyncadd %s362_s11, %s375_s4  ;;  %p510_p12 = scmp.ne.s32.totalorder %s1021_s30, 0  ;;  %s517_s22 = sshll.u32 %s809_s15, 8 }
 0x170   : > { %s1031_s21 = scalar_lea.hbm %s1086_s3, %s517_s22  ;;  %s382_s6 = sshll.u32 %s241_s29, 4  ;;  %s1033_s6 = int_to_ptr.vmem [resolvable:$true] %s382_s6 }
 0x171   : > { %s731_s7 = scalar_lea.vmem %s1033_s6, %s1021_s30  ;;  %s825_s9 = smov [#allocation7]  }
 0x172   : > { %p732_p13 = scmp.ne.s32.totalorder %s1033_s6, %s731_s7  ;;  %s735_s10 = sshll.u32 %s825_s9, 4  ;;  %s736_s10 = int_to_ptr.vmem [resolvable:$false] %s735_s10 }
 0x173   : > { %s737_s15 = scalar_lea.vmem %s736_s10, 512  ;;  %p738_p7 = scmp.lt.s32.totalorder %s1033_s6, %s736_s10 }
 0x174   : > { %p733_p1 = pnand %p732_p13, %p510_p12  ;;  %p739_p4 = scmp.lt.s32.totalorder %s737_s15, %s731_s7 }
 0x176   : > { %p734_p3 = pneg %p733_p1  ;;  %p740_p8 = por %p739_p4, %p738_p7 }
 0x178   : > { %p741_p9 = pnand %p740_p8, %p734_p3 }
 0x17a   : > { %744 = shalt.err (!%p741_p9)
}
 0x17b   : > { %s745_s5 = scalar_lea.hbm %s1031_s21, %s1021_s30  ;;  %s749_s29 = scalar_lea.hbm %s1086_s3, 640 }
 0x17c   : > { %p746_p0 = scmp.ne.s32.totalorder %s1031_s21, %s745_s5  ;;  %p750_p5 = scmp.lt.u32.totalorder %s1031_s21, %s1086_s3 }
 0x17d   : > { %p751_p6 = scmp.lt.u32.totalorder %s749_s29, %s745_s5  ;;  %p753_p13 = scmp.lt.u32.totalorder %s745_s5, %s1031_s21 }
 0x17e   : > { %p747_p11 = pnand %p746_p0, %p510_p12 }
 0x17f   : > { %p752_p10 = por %p751_p6, %p750_p5 }
 0x180   : > { %p748_p2 = pneg %p747_p11 }
 0x181   : > { %p754_p1 = por %p753_p13, %p752_p10 }
 0x183   : > { %p755_p3 = pnand %p754_p1, %p748_p2 }
 0x185   : > { %758 = shalt.err (!%p755_p3)
}
 0x186   : > { %s826_s4 = smov 128   ;;  %s827_s22 = smov 8  }
 0x187   : > { %388 = dma.vmem_to_hbm [thread:$0]  (%p510_p12), %s1033_s6, %s1021_s30, %s1031_s21, %s362_s11, %s826_s4, %s826_s4, %s827_s22  }
 0x188 PF: > { %p619_p7 = scmp.ge.s32.totalorder %s817_s17, 2  ;;  %s397_s26 = sand.u32 1, %s797_s12  }
 0x189   : > { %p1103_p4 = scmp.ne.s32.totalorder %s1095_s28, 0  ;;  %s398_s19 = scalar_lea.sflag [#allocation4], %s397_s26 }
 0x18b   : > { %p614_p8 = pnand %p619_p7, %p1103_p4 }
 0x18d   : > { %792 = dma.done.wait (!%p614_p8), %s398_s19, 256  }
 0x18e   : > { %794 = vsyncadd (!%p614_p8), %s398_s19, 4294967040  ;;  %s20_s17 = sadd.s32 1, %s817_s17   ;;  %s1104_s12 = smov %s801_s13 }
 0x18f   : > { %p17_p9 = scmp.ge.s32.totalorder %s20_s17, 5   ;;  %s1105_s13 = smov %s805_s14 }
 0x190   : > { %s1106_s14 = smov %s910_s27  ;;  %s1107_s15 = smov %s813_s16 }
 0x191   : > { %s1108_s16 = smov %s1110_s20  ;;  %19 = sbr.rel (!%p17_p9) target bundleno = 7 (0x7), region = 85 }
 0x198   :  { %403 = vsyncpa [#allocation3], 1 }
 0x199   :  { %405 = vsyncpa [#allocation3 + $0x1], 1 }
 0x19a   :  { %406 = vsyncpa [#allocation6], 1 }
 0x19b   :  { %407 = vsyncpa [#allocation4], 1 }
 0x19c   :  { %409 = vsyncpa [#allocation4 + $0x1], 1 }

</bundles_post_ra>
